<compile_context>
chip_gen: v5e
topology: v5e:2x2
jax: 0.10.0
libtpu: 0.0.40
codegen_flags: <defaults>
</compile_context>

<pallas_src>
import jax
import jax.numpy as jnp
from jax.experimental import pallas as pl
from jax.experimental.pallas import tpu as pltpu

LANE = 128  # TPU lane width (last-dim vreg width)


def _round_up(x, m):
    return ((x + m - 1) // m) * m


def _actor_kernel(action_clip, compute_dtype):
    """Kernel closure: one TILE_B-row tile of states -> actions (padded width)."""

    def kernel(x_ref, w1_ref, b1_ref, w2_ref, b2_ref,
               w3_ref, b3_ref, w4_ref, b4_ref, o_ref):
        # l1 + relu  (dot inputs in compute_dtype, f32 accumulation + epilogue)
        x = x_ref[...].astype(compute_dtype)
        h = jnp.dot(x, w1_ref[...], preferred_element_type=jnp.float32)
        h = jnp.maximum(h + b1_ref[...], 0.0)

        # l2 + relu
        h = jnp.dot(h.astype(compute_dtype), w2_ref[...],
                    preferred_element_type=jnp.float32)
        h = jnp.maximum(h + b2_ref[...], 0.0)

        # l3 + relu
        h = jnp.dot(h.astype(compute_dtype), w3_ref[...],
                    preferred_element_type=jnp.float32)
        h = jnp.maximum(h + b3_ref[...], 0.0)

        # l4 + clip * tanh  (tanh -> EUP slot, hidden under MXU/VPU work)
        a = jnp.dot(h.astype(compute_dtype), w4_ref[...],
                    preferred_element_type=jnp.float32)
        a = action_clip * jnp.tanh(a + b4_ref[...])

        o_ref[...] = a.astype(o_ref.dtype)

    return kernel


def prepare_params(params, compute_dtype=jnp.float32):
    """Zero-pad hidden/output feature dims to the 128-lane width; cast weights.

    Biases stay f32 (the elementwise epilogue runs in f32 on all chips).
    """
    s, h = params["w1"].shape
    _, a = params["w4"].shape
    hp = _round_up(h, LANE)
    ap = _round_up(a, LANE)

    def pad2(arr, rows, cols, dtype):
        return jnp.pad(arr, ((0, rows - arr.shape[0]),
                             (0, cols - arr.shape[1]))).astype(dtype)

    return {
        "w1": pad2(params["w1"], s, hp, compute_dtype),
        "b1": pad2(params["b1"], 1, hp, jnp.float32),
        "w2": pad2(params["w2"], hp, hp, compute_dtype),
        "b2": pad2(params["b2"], 1, hp, jnp.float32),
        "w3": pad2(params["w3"], hp, hp, compute_dtype),
        "b3": pad2(params["b3"], 1, hp, jnp.float32),
        "w4": pad2(params["w4"], hp, ap, compute_dtype),
        "b4": pad2(params["b4"], 1, ap, jnp.float32),
    }


def deterministic_actor_forward(state, params, *, action_clip=1.0,
                                tile_b=1024, compute_dtype=jnp.float32):
    """state: (B, state_dim) f32.  params: raw dict w1..w4 (in,out), b1..b4 (1,out)."""
    B, state_dim = state.shape
    action_dim = params["w4"].shape[1]

    # NOTE: in a real training/eval loop prepare the padded params once,
    # outside the step function; it is folded in here for a self-contained demo.
    pp = prepare_params(params, compute_dtype)
    hp = pp["w1"].shape[1]
    ap = pp["w4"].shape[1]

    # Batch tile: multiple of 8 sublanes, no bigger than the (rounded-up) batch.
    # TILE_B default 1024 amortizes per-step overhead; halve if targeting v7x's
    # smaller 64 MiB VMEM with very wide activations (not an issue here).
    tile_b = max(8, _round_up(min(tile_b, _round_up(B, 8)), 8))
    b_pad = _round_up(B, tile_b)
    if b_pad != B:
        state = jnp.pad(state, ((0, b_pad - B), (0, 0)))
    grid = (b_pad // tile_b,)

    # Activations stream over the grid; weights/biases have constant index_maps
    # so they are fetched once and stay VMEM-resident across all grid steps.
    x_spec = pl.BlockSpec((tile_b, state_dim), lambda i: (i, 0))
    resident = lambda arr: pl.BlockSpec(arr.shape, lambda i: (0, 0))
    out_spec = pl.BlockSpec((tile_b, ap), lambda i: (i, 0))

    bytes_of = lambda arr: arr.size * arr.dtype.itemsize
    cost = pl.CostEstimate(
        flops=2 * b_pad * (state_dim * hp + 2 * hp * hp + hp * ap),
        transcendentals=b_pad * ap,
        bytes_accessed=bytes_of(state)
        + sum(bytes_of(v) for v in pp.values())
        + b_pad * ap * 4,
    )

    out = pl.pallas_call(
        _actor_kernel(float(action_clip), compute_dtype),
        out_shape=jax.ShapeDtypeStruct((b_pad, ap), jnp.float32),
        grid=grid,
        in_specs=[x_spec,
                  resident(pp["w1"]), resident(pp["b1"]),
                  resident(pp["w2"]), resident(pp["b2"]),
                  resident(pp["w3"]), resident(pp["b3"]),
                  resident(pp["w4"]), resident(pp["b4"])],
        out_specs=out_spec,
        compiler_params=pltpu.CompilerParams(
            dimension_semantics=("parallel",)),  # shard batch grid over v7x's 2 TCs
        cost_estimate=cost,
    )(state,
      pp["w1"], pp["b1"], pp["w2"], pp["b2"],
      pp["w3"], pp["b3"], pp["w4"], pp["b4"])

    # Drop batch padding and the lane padding on the action dim.
    return out[:B, :action_dim]


def init_params(key, state_dim, action_dim, hidden_dim):
    """PyTorch nn.Linear-style init: U[-1/sqrt(fan_in), 1/sqrt(fan_in)].
    Weights stored (in_features, out_features); biases (1, out_features)."""
    dims = [(state_dim, hidden_dim), (hidden_dim, hidden_dim),
            (hidden_dim, hidden_dim), (hidden_dim, action_dim)]
    params = {}
    for i, (fan_in, fan_out) in enumerate(dims, start=1):
        key, kw, kb = jax.random.split(key, 3)
        bound = 1.0 / float(fan_in) ** 0.5
        params[f"w{i}"] = jax.random.uniform(
            kw, (fan_in, fan_out), jnp.float32, -bound, bound)
        params[f"b{i}"] = jax.random.uniform(
            kb, (1, fan_out), jnp.float32, -bound, bound)
    return params


def reference_forward(state, params, action_clip=1.0, compute_dtype=jnp.float32):
    """Pure-JAX reference matching the PyTorch semantics; dot inputs cast to
    compute_dtype so the bf16 kernel variant can be checked tightly."""
    def lin(x, w, b):
        return jnp.dot(x.astype(compute_dtype), w.astype(compute_dtype),
                       preferred_element_type=jnp.float32) + b
    h = jax.nn.relu(lin(state, params["w1"], params["b1"]))
    h = jax.nn.relu(lin(h, params["w2"], params["b2"]))
    h = jax.nn.relu(lin(h, params["w3"], params["b3"]))
    return action_clip * jnp.tanh(lin(h, params["w4"], params["b4"]))


if __name__ == "__main__":
    # Small shapes consistent with the module's forward.
    batch = 200        # non-multiple of tile_b -> exercises batch padding
    state_dim = 16
    action_dim = 8
    hidden_dim = 32    # padded to 128 lanes inside the kernel
    action_clip = 1.0
    tile_b = 128       # -> 1-D grid of 2 batch tiles

    key = jax.random.PRNGKey(0)
    key, k_state = jax.random.split(key)
    params = init_params(key, state_dim, action_dim, hidden_dim)
    state = jax.random.normal(k_state, (batch, state_dim), jnp.float32)

    fwd = jax.jit(deterministic_actor_forward,
                  static_argnames=("action_clip", "tile_b", "compute_dtype"))

    # f32 path: exact PyTorch-module semantics.
    act_f32 = jax.block_until_ready(
        fwd(state, params, action_clip=action_clip, tile_b=tile_b,
            compute_dtype=jnp.float32))
    ref_f32 = reference_forward(state, params, action_clip)
    assert act_f32.shape == (batch, action_dim)
    assert jnp.allclose(act_f32, ref_f32, atol=2e-5, rtol=2e-5), "f32 mismatch"

    # bf16 dot inputs (perf path for v6e/v7x), f32 accumulation + f32 epilogue.
    act_bf16 = jax.block_until_ready(
        fwd(state, params, action_clip=action_clip, tile_b=tile_b,
            compute_dtype=jnp.bfloat16))
    ref_bf16 = reference_forward(state, params, action_clip, jnp.bfloat16)
    assert act_bf16.shape == (batch, action_dim)
    assert jnp.allclose(act_bf16, ref_bf16, atol=1e-3, rtol=1e-2), "bf16 mismatch"

    print("KERNEL_OK")
</pallas_src>

<mosaic_0001>
module attributes {stable_mosaic.version = 11 : i64} {
  func.func @kernel(%arg0: i32, %arg1: memref<128x16xf32, #tpu.memory_space<vmem>>, %arg2: memref<16x128xf32, #tpu.memory_space<vmem>>, %arg3: memref<1x128xf32, #tpu.memory_space<vmem>>, %arg4: memref<128x128xf32, #tpu.memory_space<vmem>>, %arg5: memref<1x128xf32, #tpu.memory_space<vmem>>, %arg6: memref<128x128xf32, #tpu.memory_space<vmem>>, %arg7: memref<1x128xf32, #tpu.memory_space<vmem>>, %arg8: memref<128x128xf32, #tpu.memory_space<vmem>>, %arg9: memref<1x128xf32, #tpu.memory_space<vmem>>, %arg10: memref<128x128xf32, #tpu.memory_space<vmem>>) attributes {dimension_semantics = [#tpu.dimension_semantics<parallel>], iteration_bounds = array<i64: 2>, scalar_prefetch = 0 : i64, scratch_operands = 0 : i64, tpu.core_type = #tpu.core_type<tc>, window_params = [{transform_indices = @transform_0, window_bounds = array<i64: 128, 16>}, {pipeline_mode = #tpu.pipeline_mode<synchronous>, transform_indices = @transform_1, window_bounds = array<i64: 16, 128>}, {pipeline_mode = #tpu.pipeline_mode<synchronous>, transform_indices = @transform_2, window_bounds = array<i64: 1, 128>}, {pipeline_mode = #tpu.pipeline_mode<synchronous>, transform_indices = @transform_3, window_bounds = array<i64: 128, 128>}, {pipeline_mode = #tpu.pipeline_mode<synchronous>, transform_indices = @transform_4, window_bounds = array<i64: 1, 128>}, {pipeline_mode = #tpu.pipeline_mode<synchronous>, transform_indices = @transform_5, window_bounds = array<i64: 128, 128>}, {pipeline_mode = #tpu.pipeline_mode<synchronous>, transform_indices = @transform_6, window_bounds = array<i64: 1, 128>}, {pipeline_mode = #tpu.pipeline_mode<synchronous>, transform_indices = @transform_7, window_bounds = array<i64: 128, 128>}, {pipeline_mode = #tpu.pipeline_mode<synchronous>, transform_indices = @transform_8, window_bounds = array<i64: 1, 128>}, {transform_indices = @transform_9, window_bounds = array<i64: 128, 128>}]} {
    %c0 = arith.constant 0 : index
    %c0_0 = arith.constant 0 : index
    %0 = vector.load %arg1[%c0, %c0_0] : memref<128x16xf32, #tpu.memory_space<vmem>>, vector<128x16xf32>
    %c0_1 = arith.constant 0 : index
    %c0_2 = arith.constant 0 : index
    %1 = vector.load %arg2[%c0_1, %c0_2] : memref<16x128xf32, #tpu.memory_space<vmem>>, vector<16x128xf32>
    %cst = arith.constant dense<0.000000e+00> : vector<128x128xf32>
    %2 = tpu.matmul %0, %1, %cst {dimension_numbers = #tpu.dot_dimension_numbers<[1], [0], [0], [1], [0, 0, 1, 1], [], []>} : vector<128x16xf32>, vector<16x128xf32>, vector<128x128xf32> -> vector<128x128xf32>
    %c0_3 = arith.constant 0 : index
    %c0_4 = arith.constant 0 : index
    %3 = vector.load %arg3[%c0_3, %c0_4] : memref<1x128xf32, #tpu.memory_space<vmem>>, vector<1x128xf32>
    %4 = vector.broadcast %3 : vector<1x128xf32> to vector<128x128xf32>
    %5 = arith.addf %2, %4 : vector<128x128xf32>
    %cst_5 = arith.constant 0.000000e+00 : f32
    %6 = vector.broadcast %cst_5 : f32 to vector<128x128xf32>
    %7 = arith.maximumf %5, %6 : vector<128x128xf32>
    %c0_6 = arith.constant 0 : index
    %c0_7 = arith.constant 0 : index
    %8 = vector.load %arg4[%c0_6, %c0_7] : memref<128x128xf32, #tpu.memory_space<vmem>>, vector<128x128xf32>
    %cst_8 = arith.constant dense<0.000000e+00> : vector<128x128xf32>
    %9 = tpu.matmul %7, %8, %cst_8 {dimension_numbers = #tpu.dot_dimension_numbers<[1], [0], [0], [1], [0, 0, 1, 1], [], []>} : vector<128x128xf32>, vector<128x128xf32>, vector<128x128xf32> -> vector<128x128xf32>
    %c0_9 = arith.constant 0 : index
    %c0_10 = arith.constant 0 : index
    %10 = vector.load %arg5[%c0_9, %c0_10] : memref<1x128xf32, #tpu.memory_space<vmem>>, vector<1x128xf32>
    %11 = vector.broadcast %10 : vector<1x128xf32> to vector<128x128xf32>
    %12 = arith.addf %9, %11 : vector<128x128xf32>
    %cst_11 = arith.constant 0.000000e+00 : f32
    %13 = vector.broadcast %cst_11 : f32 to vector<128x128xf32>
    %14 = arith.maximumf %12, %13 : vector<128x128xf32>
    %c0_12 = arith.constant 0 : index
    %c0_13 = arith.constant 0 : index
    %15 = vector.load %arg6[%c0_12, %c0_13] : memref<128x128xf32, #tpu.memory_space<vmem>>, vector<128x128xf32>
    %cst_14 = arith.constant dense<0.000000e+00> : vector<128x128xf32>
    %16 = tpu.matmul %14, %15, %cst_14 {dimension_numbers = #tpu.dot_dimension_numbers<[1], [0], [0], [1], [0, 0, 1, 1], [], []>} : vector<128x128xf32>, vector<128x128xf32>, vector<128x128xf32> -> vector<128x128xf32>
    %c0_15 = arith.constant 0 : index
    %c0_16 = arith.constant 0 : index
    %17 = vector.load %arg7[%c0_15, %c0_16] : memref<1x128xf32, #tpu.memory_space<vmem>>, vector<1x128xf32>
    %18 = vector.broadcast %17 : vector<1x128xf32> to vector<128x128xf32>
    %19 = arith.addf %16, %18 : vector<128x128xf32>
    %cst_17 = arith.constant 0.000000e+00 : f32
    %20 = vector.broadcast %cst_17 : f32 to vector<128x128xf32>
    %21 = arith.maximumf %19, %20 : vector<128x128xf32>
    %c0_18 = arith.constant 0 : index
    %c0_19 = arith.constant 0 : index
    %22 = vector.load %arg8[%c0_18, %c0_19] : memref<128x128xf32, #tpu.memory_space<vmem>>, vector<128x128xf32>
    %cst_20 = arith.constant dense<0.000000e+00> : vector<128x128xf32>
    %23 = tpu.matmul %21, %22, %cst_20 {dimension_numbers = #tpu.dot_dimension_numbers<[1], [0], [0], [1], [0, 0, 1, 1], [], []>} : vector<128x128xf32>, vector<128x128xf32>, vector<128x128xf32> -> vector<128x128xf32>
    %c0_21 = arith.constant 0 : index
    %c0_22 = arith.constant 0 : index
    %24 = vector.load %arg9[%c0_21, %c0_22] : memref<1x128xf32, #tpu.memory_space<vmem>>, vector<1x128xf32>
    %25 = vector.broadcast %24 : vector<1x128xf32> to vector<128x128xf32>
    %26 = arith.addf %23, %25 : vector<128x128xf32>
    %27 = math.tanh %26 : vector<128x128xf32>
    %cst_23 = arith.constant 1.000000e+00 : f32
    %28 = vector.broadcast %cst_23 : f32 to vector<128x128xf32>
    %29 = arith.mulf %28, %27 : vector<128x128xf32>
    %c0_24 = arith.constant 0 : index
    %c0_25 = arith.constant 0 : index
    %30 = vector.load %arg10[%c0_24, %c0_25] : memref<128x128xf32, #tpu.memory_space<vmem>>, vector<128x128xf32>
    tpu.vector_store %arg10[%c0_24, %c0_25], %29 {strides = array<i32>} : memref<128x128xf32, #tpu.memory_space<vmem>>, vector<128x128xf32>,
    return
  }
  func.func @transform_0(%arg0: i32) -> (i32, i32) {
    %c0_i32 = arith.constant 0 : i32
    %c0_i32_0 = arith.constant 0 : i32
    return %arg0, %c0_i32 : i32, i32
  }
  func.func @transform_1(%arg0: i32) -> (i32, i32) {
    %c0_i32 = arith.constant 0 : i32
    %c0_i32_0 = arith.constant 0 : i32
    %c0_i32_1 = arith.constant 0 : i32
    return %c0_i32, %c0_i32_0 : i32, i32
  }
  func.func @transform_2(%arg0: i32) -> (i32, i32) {
    %c0_i32 = arith.constant 0 : i32
    %c0_i32_0 = arith.constant 0 : i32
    %c0_i32_1 = arith.constant 0 : i32
    return %c0_i32, %c0_i32_0 : i32, i32
  }
  func.func @transform_3(%arg0: i32) -> (i32, i32) {
    %c0_i32 = arith.constant 0 : i32
    %c0_i32_0 = arith.constant 0 : i32
    %c0_i32_1 = arith.constant 0 : i32
    return %c0_i32, %c0_i32_0 : i32, i32
  }
  func.func @transform_4(%arg0: i32) -> (i32, i32) {
    %c0_i32 = arith.constant 0 : i32
    %c0_i32_0 = arith.constant 0 : i32
    %c0_i32_1 = arith.constant 0 : i32
    return %c0_i32, %c0_i32_0 : i32, i32
  }
  func.func @transform_5(%arg0: i32) -> (i32, i32) {
    %c0_i32 = arith.constant 0 : i32
    %c0_i32_0 = arith.constant 0 : i32
    %c0_i32_1 = arith.constant 0 : i32
    return %c0_i32, %c0_i32_0 : i32, i32
  }
  func.func @transform_6(%arg0: i32) -> (i32, i32) {
    %c0_i32 = arith.constant 0 : i32
    %c0_i32_0 = arith.constant 0 : i32
    %c0_i32_1 = arith.constant 0 : i32
    return %c0_i32, %c0_i32_0 : i32, i32
  }
  func.func @transform_7(%arg0: i32) -> (i32, i32) {
    %c0_i32 = arith.constant 0 : i32
    %c0_i32_0 = arith.constant 0 : i32
    %c0_i32_1 = arith.constant 0 : i32
    return %c0_i32, %c0_i32_0 : i32, i32
  }
  func.func @transform_8(%arg0: i32) -> (i32, i32) {
    %c0_i32 = arith.constant 0 : i32
    %c0_i32_0 = arith.constant 0 : i32
    %c0_i32_1 = arith.constant 0 : i32
    return %c0_i32, %c0_i32_0 : i32, i32
  }
  func.func @transform_9(%arg0: i32) -> (i32, i32) {
    %c0_i32 = arith.constant 0 : i32
    %c0_i32_0 = arith.constant 0 : i32
    return %arg0, %c0_i32 : i32, i32
  }
}

</mosaic_0001>

<bundles_post_ra>
// kernel: deterministic_actor_forward.1
= control target key start
LH: loop header
LB: loop body
LE: loop exit
PB: predicated region body
PF: predicated region fallthrough
CT: control target
= control target key end

     0   :  { %s992_s30 = smov 0   ;;  %s1284_s0 = inlined_call_operand.vmem [shape: f32[256,16], index: 0, kind: input, shape index: {}]   ;;  %s1285_s1 = inlined_call_operand.vmem [shape: f32[16,128], index: 1, kind: input, shape index: {}]   ;;  %s1286_s2 = inlined_call_operand.vmem [shape: f32[1,128], index: 2, kind: input, shape index: {}]   ;;  %s1287_s3 = inlined_call_operand.vmem [shape: f32[128,128], index: 3, kind: input, shape index: {}]   ;;  %s1288_s4 = inlined_call_operand.vmem [shape: f32[1,128], index: 4, kind: input, shape index: {}]   ;;  %s1289_s5 = inlined_call_operand.vmem [shape: f32[128,128], index: 5, kind: input, shape index: {}]   ;;  %s1290_s6 = inlined_call_operand.vmem [shape: f32[1,128], index: 6, kind: input, shape index: {}]   ;;  %s1291_s7 = inlined_call_operand.vmem [shape: f32[128,128], index: 7, kind: input, shape index: {}]   ;;  %s1292_s8 = inlined_call_operand.vmem [shape: f32[1,128], index: 8, kind: input, shape index: {}]   ;;  %s1293_s9 = inlined_call_operand.vmem [shape: f32[256,128], index: 9, kind: output, shape index: {}]  }
   0x1 LB: > { %s863_s10 = sadd.s32 4294967295, %s940_s30   ;;  %p867_p0 = scmp.ge.s32.totalorder %s940_s30, 1  ;;  %s940_s30 = sphi %s992_s30, %s19_s30  }
   0x2   : > { %p288_p1 = scmp.lt.s32.totalorder %s940_s30, 3 }
   0x4   : > { %p289_p2 = pnand %p867_p0, %p288_p1 }
   0x5   : > { %s868_s15 = sshll.u32 (!%p289_p2), %s863_s10, 4 }
   0x6   : > { %292 = sbr.rel (%p289_p2) target bundleno = 673 (0x2a1), region = 56  ;;  %p325_p3 = scmp.lt.s32.totalorder (!%p289_p2), %s868_s15, 31 }
   0xb   : > { %v353_v0 = vld [vmem:[%s1285_s1 + $0x8] sm:$0xff]  ;;  %v352_v1 = vld [vmem:[%s1285_s1] sm:$0xff]  ;;  %s1295_s15 = smov (!%p325_p3, %s868_s15), 31  ;;  %vm358_vm0 = vcmask 130048   ;;  %v503_v11 = vld [vmem:[%s1287_s3 + $0x78] sm:$0xff] }
   0xc   : > { %421 = vmatpush.msra.mxu0 %v353_v0  ;;  %s869_s16 = sshll.u32 %s1295_s15, 3  ;;  %v502_v12 = vld [vmem:[%s1287_s3 + $0x70] sm:$0xff]  ;;  %508 = vmatpush.msra.mxu1 %v503_v11  ;;  %v501_v13 = vld [vmem:[%s1287_s3 + $0x68] sm:$0xff]  ;;  %v500_v15 = vld [vmem:[%s1287_s3 + $0x60] sm:$0xff] }
   0xd   : > { %s1014_s19 = scalar_lea.vmem %s1284_s0, %s869_s16  ;;  %v499_v16 = vld [vmem:[%s1287_s3 + $0x58] sm:$0xff]  ;;  %v498_v17 = vld [vmem:[%s1287_s3 + $0x50] sm:$0xff]  ;;  %v497_v18 = vld [vmem:[%s1287_s3 + $0x48] sm:$0xff] }
   0xe   : > { %422 = vmatpush.msra.mxu0 %v352_v1  ;;  %v336_v2 = vld [vmem:[%s1014_s19] sm:$0xff]  ;;  %v337_v3 = vld [vmem:[%s1014_s19 + $0x8] sm:$0xff]  ;;  %v338_v4 = vld [vmem:[%s1014_s19 + $0x10] sm:$0xff]  ;;  %509 = vmatpush.msra.mxu1 %v502_v12 }
   0xf   : > { %872 = vmatmul.msk.f32.vlgmr.msra.gmra.mxu0 %vm358_vm0, %v336_v2  ;;  %v339_v5 = vld [vmem:[%s1014_s19 + $0x18] sm:$0xff]  ;;  %v340_v6 = vld [vmem:[%s1014_s19 + $0x20] sm:$0xff]  ;;  %v341_v7 = vld [vmem:[%s1014_s19 + $0x28] sm:$0xff] }
  0x10   : > { %v342_v8 = vld [vmem:[%s1014_s19 + $0x30] sm:$0xff]  ;;  %v343_v9 = vld [vmem:[%s1014_s19 + $0x38] sm:$0xff]  ;;  %v344_v10 = vld [vmem:[%s1014_s19 + $0x40] sm:$0xff]  ;;  %510 = vmatpush.msra.mxu1 %v501_v13 }
  0x11   : > { %v345_v14 = vld [vmem:[%s1014_s19 + $0x48] sm:$0xff]  ;;  %v346_v19 = vld [vmem:[%s1014_s19 + $0x50] sm:$0xff]  ;;  %v496_v20 = vld [vmem:[%s1287_s3 + $0x40] sm:$0xff] }
  0x12   : > { %511 = vmatpush.msra.mxu1 %v500_v15  ;;  %v495_v21 = vld [vmem:[%s1287_s3 + $0x38] sm:$0xff]  ;;  %v494_v22 = vld [vmem:[%s1287_s3 + $0x30] sm:$0xff]  ;;  %v493_v23 = vld [vmem:[%s1287_s3 + $0x28] sm:$0xff] }
  0x13   : > { %v347_v24 = vld [vmem:[%s1014_s19 + $0x58] sm:$0xff]  ;;  %v492_v25 = vld [vmem:[%s1287_s3 + $0x20] sm:$0xff]  ;;  %v490_v27 = vld [vmem:[%s1287_s3 + $0x10] sm:$0xff] }
  0x14   : > { %512 = vmatpush.msra.mxu1 %v499_v16  ;;  %v491_v26 = vld [vmem:[%s1287_s3 + $0x18] sm:$0xff]  ;;  %v348_v28 = vld [vmem:[%s1014_s19 + $0x60] sm:$0xff]  ;;  %v489_v29 = vld [vmem:[%s1287_s3 + $0x8] sm:$0xff] }
  0x15   : > { %v488_v30 = vld [vmem:[%s1287_s3] sm:$0xff]  ;;  %v349_v31 = vld [vmem:[%s1014_s19 + $0x68] sm:$0xff]  ;;  %v350_v32 = vld [vmem:[%s1014_s19 + $0x70] sm:$0xff] }
  0x16   : > { %513 = vmatpush.msra.mxu1 %v498_v17  ;;  %v351_v33 = vld [vmem:[%s1014_s19 + $0x78] sm:$0xff]  ;;  %v1099_v34 = vld [vmem:[%s1286_s2] ss:$0 sm:$0xff]  ;;  %v603_v1 = vld [vmem:[%s1289_s5 + $0x70] sm:$0xff]  ;;  %s1248_s19 = scalar_lea.vmem %s1293_s9, %s869_s16 }
  0x17   : > { %873 = vmatmul.msk.f32.gmra.mxu0 %vm358_vm0, %v337_v3  ;;  %v604_v62 = vld [vmem:[%s1289_s5 + $0x78] sm:$0xff]  ;;  %v602_v3 = vld [vmem:[%s1289_s5 + $0x68] sm:$0xff]  ;;  %v597_v11 = vld [vmem:[%s1289_s5 + $0x40] sm:$0xff] }
  0x18   : > { %514 = vmatpush.msra.mxu1 %v497_v18  ;;  %609 = vmatpush.msra.mxu2 %v604_v62  ;;  %v596_v12 = vld [vmem:[%s1289_s5 + $0x38] sm:$0xff]  ;;  %v595_v15 = vld [vmem:[%s1289_s5 + $0x30] sm:$0xff]  ;;  %v594_v17 = vld [vmem:[%s1289_s5 + $0x28] sm:$0xff] }
  0x19   : > { %v593_v18 = vld [vmem:[%s1289_s5 + $0x20] sm:$0xff] }
  0x1a   : > { %515 = vmatpush.msra.mxu1 %v496_v20  ;;  %610 = vmatpush.msra.mxu2 %v603_v1 }
  0x1c   : > { %516 = vmatpush.msra.mxu1 %v495_v21  ;;  %611 = vmatpush.msra.mxu2 %v602_v3  ;;  %v704_v3 = vld [vmem:[%s1291_s7 + $0x70] sm:$0xff] }
  0x1e   : > { %517 = vmatpush.msra.mxu1 %v494_v22  ;;  %v591_v22 = vld [vmem:[%s1289_s5 + $0x10] sm:$0xff] }
  0x1f   : > { %874 = vmatmul.msk.f32.gmra.mxu0 %vm358_vm0, %v338_v4  ;;  %v601_v4 = vld [vmem:[%s1289_s5 + $0x60] sm:$0xff] }
  0x20   : > { %518 = vmatpush.msra.mxu1 %v493_v23  ;;  %612 = vmatpush.msra.mxu2 %v601_v4 }
  0x22   : > { %519 = vmatpush.msra.mxu1 %v492_v25  ;;  %v589_v25 = vld [vmem:[%s1289_s5] sm:$0xff] }
  0x24   : > { %520 = vmatpush.msra.mxu1 %v491_v26 }
  0x26   : > { %521 = vmatpush.msra.mxu1 %v490_v27 }
  0x27   : > { %875 = vmatmul.msk.f32.gmra.mxu0 %vm358_vm0, %v339_v5  ;;  %v600_v5 = vld [vmem:[%s1289_s5 + $0x58] sm:$0xff] }
  0x28   : > { %522 = vmatpush.msra.mxu1 %v489_v29  ;;  %613 = vmatpush.msra.mxu2 %v600_v5 }
  0x2a   : > { %523 = vmatpush.msra.mxu1 %v488_v30 }
  0x2f   : > { %876 = vmatmul.msk.f32.gmra.mxu0 %vm358_vm0, %v340_v6 }
  0x37   : > { %877 = vmatmul.msk.f32.gmra.mxu0 %vm358_vm0, %v341_v7 }
  0x3f   : > { %878 = vmatmul.msk.f32.gmra.mxu0 %vm358_vm0, %v342_v8  ;;  %v599_v8 = vld [vmem:[%s1289_s5 + $0x50] sm:$0xff] }
  0x40   : > { %614 = vmatpush.msra.mxu2 %v599_v8  ;;  %v702_v8 = vld [vmem:[%s1291_s7 + $0x60] sm:$0xff] }
  0x47   : > { %879 = vmatmul.msk.f32.gmra.mxu0 %vm358_vm0, %v343_v9 }
  0x4f   : > { %880 = vmatmul.msk.f32.gmra.mxu0 %vm358_vm0, %v344_v10  ;;  %v598_v10 = vld [vmem:[%s1289_s5 + $0x48] sm:$0xff] }
  0x50   : > { %615 = vmatpush.msra.mxu2 %v598_v10  ;;  %v700_v10 = vld [vmem:[%s1291_s7 + $0x50] sm:$0xff] }
  0x52   : > { %616 = vmatpush.msra.mxu2 %v597_v11 }
  0x54   : > { %617 = vmatpush.msra.mxu2 %v596_v12 }
  0x56   : > { %618 = vmatpush.msra.mxu2 %v595_v15  ;;  %v698_v15 = vld [vmem:[%s1291_s7 + $0x40] sm:$0xff] }
  0x57   : > { %881 = vmatmul.msk.f32.gmra.mxu0 %vm358_vm0, %v345_v14 }
  0x58   : > { %619 = vmatpush.msra.mxu2 %v594_v17  ;;  %v696_v17 = vld [vmem:[%s1291_s7 + $0x30] sm:$0xff] }
  0x5a   : > { %620 = vmatpush.msra.mxu2 %v593_v18  ;;  %v695_v18 = vld [vmem:[%s1291_s7 + $0x28] sm:$0xff] }
  0x5f   : > { %882 = vmatmul.msk.f32.gmra.mxu0 %vm358_vm0, %v346_v19  ;;  %v592_v19 = vld [vmem:[%s1289_s5 + $0x18] sm:$0xff] }
  0x60   : > { %621 = vmatpush.msra.mxu2 %v592_v19 }
  0x62   : > { %622 = vmatpush.msra.mxu2 %v591_v22 }
  0x67   : > { %883 = vmatmul.msk.f32.gmra.mxu0 %vm358_vm0, %v347_v24  ;;  %v590_v24 = vld [vmem:[%s1289_s5 + $0x8] sm:$0xff] }
  0x68   : > { %623 = vmatpush.msra.mxu2 %v590_v24  ;;  %v692_v24 = vld [vmem:[%s1291_s7 + $0x10] sm:$0xff] }
  0x6a   : > { %624 = vmatpush.msra.mxu2 %v589_v25 }
  0x6f   : > { %884 = vmatmul.msk.f32.gmra.mxu0 %vm358_vm0, %v348_v28 }
  0x77   : > { %885 = vmatmul.msk.f32.gmra.mxu0 %vm358_vm0, %v349_v31 }
  0x7f   : > { %886 = vmatmul.msk.f32.gmra.mxu0 %vm358_vm0, %v350_v32 }
  0x87   : > { %887 = vmatmul.msk.f32.gmra.mxu0 %vm358_vm0, %v351_v33 }
  0x8c   : > { %v424_v35 = vpop.f32.mrf.mxu0 }
  0x8d   : > { %v425_v36 = vadd.f32 %v1099_v34, %v424_v35 }
  0x8f   : > { %v472_v37 = vmax.f32 %v425_v36, 0.0  ;;  %v1168_v36 = vld [vmem:[%s1288_s4] ss:$0 sm:$0xff] }
  0x91   : > { %524 = vmatmul.f32.vlgmr.msra.gmra.mxu1 %v472_v37 }
  0x94   : > { %v427_v38 = vpop.f32.mrf.mxu0 }
  0x95   : > { %v428_v39 = vadd.f32 %v1099_v34, %v427_v38 }
  0x97   : > { %v473_v40 = vmax.f32 %v428_v39, 0.0 }
  0x99   : > { %527 = vmatmul.f32.gmra.mxu1 %v473_v40 }
  0x9c   : > { %v430_v41 = vpop.f32.mrf.mxu0 }
  0x9d   : > { %v431_v42 = vadd.f32 %v1099_v34, %v430_v41 }
  0x9f   : > { %v474_v43 = vmax.f32 %v431_v42, 0.0 }
  0xa1   : > { %530 = vmatmul.f32.gmra.mxu1 %v474_v43 }
  0xa4   : > { %v433_v44 = vpop.f32.mrf.mxu0 }
  0xa5   : > { %v434_v45 = vadd.f32 %v1099_v34, %v433_v44 }
  0xa7   : > { %v475_v46 = vmax.f32 %v434_v45, 0.0 }
  0xa9   : > { %533 = vmatmul.f32.gmra.mxu1 %v475_v46 }
  0xac   : > { %v436_v47 = vpop.f32.mrf.mxu0 }
  0xad   : > { %v437_v48 = vadd.f32 %v1099_v34, %v436_v47 }
  0xaf   : > { %v476_v49 = vmax.f32 %v437_v48, 0.0 }
  0xb1   : > { %536 = vmatmul.f32.gmra.mxu1 %v476_v49 }
  0xb4   : > { %v439_v50 = vpop.f32.mrf.mxu0 }
  0xb5   : > { %v440_v51 = vadd.f32 %v1099_v34, %v439_v50 }
  0xb7   : > { %v477_v52 = vmax.f32 %v440_v51, 0.0 }
  0xb9   : > { %539 = vmatmul.f32.gmra.mxu1 %v477_v52 }
  0xbc   : > { %v442_v53 = vpop.f32.mrf.mxu0 }
  0xbd   : > { %v443_v54 = vadd.f32 %v1099_v34, %v442_v53 }
  0xbf   : > { %v478_v55 = vmax.f32 %v443_v54, 0.0 }
  0xc1   : > { %542 = vmatmul.f32.gmra.mxu1 %v478_v55 }
  0xc4   : > { %v445_v56 = vpop.f32.mrf.mxu0 }
  0xc5   : > { %v446_v57 = vadd.f32 %v1099_v34, %v445_v56 }
  0xc7   : > { %v479_v58 = vmax.f32 %v446_v57, 0.0 }
  0xc9   : > { %545 = vmatmul.f32.gmra.mxu1 %v479_v58 }
  0xcc   : > { %v448_v59 = vpop.f32.mrf.mxu0 }
  0xcd   : > { %v449_v60 = vadd.f32 %v1099_v34, %v448_v59 }
  0xcf   : > { %v480_v61 = vmax.f32 %v449_v60, 0.0 }
  0xd1   : > { %548 = vmatmul.f32.gmra.mxu1 %v480_v61 }
  0xd4   : > { %v451_v63 = vpop.f32.mrf.mxu0 }
  0xd5   : > { %v452_v0 = vadd.f32 %v1099_v34, %v451_v63 }
  0xd7   : > { %v481_v2 = vmax.f32 %v452_v0, 0.0 }
  0xd9   : > { %551 = vmatmul.f32.gmra.mxu1 %v481_v2  ;;  %v705_v2 = vld [vmem:[%s1291_s7 + $0x78] sm:$0xff] }
  0xda   : > { %710 = vmatpush.msra.mxu3 %v705_v2 }
  0xdc   : > { %v454_v6 = vpop.f32.mrf.mxu0  ;;  %711 = vmatpush.msra.mxu3 %v704_v3 }
  0xdd   : > { %v455_v7 = vadd.f32 %v1099_v34, %v454_v6  ;;  %v703_v6 = vld [vmem:[%s1291_s7 + $0x68] sm:$0xff] }
  0xde   : > { %712 = vmatpush.msra.mxu3 %v703_v6 }
  0xdf   : > { %v482_v9 = vmax.f32 %v455_v7, 0.0 }
  0xe0   : > { %713 = vmatpush.msra.mxu3 %v702_v8 }
  0xe1   : > { %554 = vmatmul.f32.gmra.mxu1 %v482_v9  ;;  %v701_v9 = vld [vmem:[%s1291_s7 + $0x58] sm:$0xff] }
  0xe2   : > { %714 = vmatpush.msra.mxu3 %v701_v9 }
  0xe4   : > { %v457_v13 = vpop.f32.mrf.mxu0  ;;  %715 = vmatpush.msra.mxu3 %v700_v10 }
  0xe5   : > { %v458_v14 = vadd.f32 %v1099_v34, %v457_v13  ;;  %v699_v13 = vld [vmem:[%s1291_s7 + $0x48] sm:$0xff] }
  0xe6   : > { %716 = vmatpush.msra.mxu3 %v699_v13 }
  0xe7   : > { %v483_v16 = vmax.f32 %v458_v14, 0.0 }
  0xe8   : > { %717 = vmatpush.msra.mxu3 %v698_v15 }
  0xe9   : > { %557 = vmatmul.f32.gmra.mxu1 %v483_v16  ;;  %v697_v16 = vld [vmem:[%s1291_s7 + $0x38] sm:$0xff] }
  0xea   : > { %718 = vmatpush.msra.mxu3 %v697_v16 }
  0xec   : > { %v460_v20 = vpop.f32.mrf.mxu0  ;;  %719 = vmatpush.msra.mxu3 %v696_v17 }
  0xed   : > { %v461_v21 = vadd.f32 %v1099_v34, %v460_v20 }
  0xee   : > { %720 = vmatpush.msra.mxu3 %v695_v18 }
  0xef   : > { %v484_v23 = vmax.f32 %v461_v21, 0.0  ;;  %v694_v21 = vld [vmem:[%s1291_s7 + $0x20] sm:$0xff] }
  0xf0   : > { %721 = vmatpush.msra.mxu3 %v694_v21  ;;  %v1240_v21 = vld [vmem:[%s1292_s8] ss:$0 sm:$0xff] }
  0xf1   : > { %560 = vmatmul.f32.gmra.mxu1 %v484_v23  ;;  %v693_v23 = vld [vmem:[%s1291_s7 + $0x18] sm:$0xff] }
  0xf2   : > { %722 = vmatpush.msra.mxu3 %v693_v23 }
  0xf4   : > { %v463_v26 = vpop.f32.mrf.mxu0  ;;  %723 = vmatpush.msra.mxu3 %v692_v24 }
  0xf5   : > { %v464_v27 = vadd.f32 %v1099_v34, %v463_v26 }
  0xf7   : > { %v485_v28 = vmax.f32 %v464_v27, 0.0  ;;  %v691_v27 = vld [vmem:[%s1291_s7 + $0x8] sm:$0xff] }
  0xf8   : > { %724 = vmatpush.msra.mxu3 %v691_v27 }
  0xf9   : > { %563 = vmatmul.f32.gmra.mxu1 %v485_v28 }
  0xfc   : > { %v466_v29 = vpop.f32.mrf.mxu0 }
  0xfd   : > { %v467_v30 = vadd.f32 %v1099_v34, %v466_v29  ;;  %v690_v29 = vld [vmem:[%s1291_s7] sm:$0xff] }
  0xfe   : > { %725 = vmatpush.msra.mxu3 %v690_v29 }
  0xff   : > { %v486_v31 = vmax.f32 %v467_v30, 0.0 }
 0x101   : > { %566 = vmatmul.f32.gmra.mxu1 %v486_v31 }
 0x104   : > { %v469_v32 = vpop.f32.mrf.mxu0 }
 0x105   : > { %v470_v33 = vadd.f32 %v1099_v34, %v469_v32 }
 0x107   : > { %v487_v35 = vmax.f32 %v470_v33, 0.0 }
 0x109   : > { %569 = vmatmul.f32.gmra.mxu1 %v487_v35 }
 0x10e   : > { %v525_v37 = vpop.f32.mrf.mxu1 }
 0x10f   : > { %v526_v38 = vadd.f32 %v1168_v36, %v525_v37 }
 0x111   : > { %v573_v39 = vmax.f32 %v526_v38, 0.0  ;;  %v900_v38 = vld [vmem:[%s1290_s6] ss:$0 sm:$0xff] }
 0x113   : > { %625 = vmatmul.f32.vlgmr.msra.gmra.mxu2 %v573_v39 }
 0x116   : > { %v528_v40 = vpop.f32.mrf.mxu1 }
 0x117   : > { %v529_v41 = vadd.f32 %v1168_v36, %v528_v40 }
 0x119   : > { %v574_v42 = vmax.f32 %v529_v41, 0.0 }
 0x11b   : > { %628 = vmatmul.f32.gmra.mxu2 %v574_v42 }
 0x11e   : > { %v531_v43 = vpop.f32.mrf.mxu1 }
 0x11f   : > { %v532_v34 = vadd.f32 %v1168_v36, %v531_v43 }
 0x121   : > { %v575_v44 = vmax.f32 %v532_v34, 0.0 }
 0x123   : > { %631 = vmatmul.f32.gmra.mxu2 %v575_v44 }
 0x126   : > { %v534_v45 = vpop.f32.mrf.mxu1 }
 0x127   : > { %v535_v46 = vadd.f32 %v1168_v36, %v534_v45 }
 0x129   : > { %v576_v47 = vmax.f32 %v535_v46, 0.0 }
 0x12b   : > { %634 = vmatmul.f32.gmra.mxu2 %v576_v47 }
 0x12e   : > { %v537_v48 = vpop.f32.mrf.mxu1 }
 0x12f   : > { %v538_v49 = vadd.f32 %v1168_v36, %v537_v48 }
 0x131   : > { %v577_v50 = vmax.f32 %v538_v49, 0.0 }
 0x133   : > { %637 = vmatmul.f32.gmra.mxu2 %v577_v50 }
 0x136   : > { %v540_v51 = vpop.f32.mrf.mxu1 }
 0x137   : > { %v541_v52 = vadd.f32 %v1168_v36, %v540_v51 }
 0x139   : > { %v578_v53 = vmax.f32 %v541_v52, 0.0 }
 0x13b   : > { %640 = vmatmul.f32.gmra.mxu2 %v578_v53 }
 0x13e   : > { %v543_v54 = vpop.f32.mrf.mxu1 }
 0x13f   : > { %v544_v55 = vadd.f32 %v1168_v36, %v543_v54 }
 0x141   : > { %v579_v56 = vmax.f32 %v544_v55, 0.0 }
 0x143   : > { %643 = vmatmul.f32.gmra.mxu2 %v579_v56 }
 0x146   : > { %v546_v57 = vpop.f32.mrf.mxu1 }
 0x147   : > { %v547_v58 = vadd.f32 %v1168_v36, %v546_v57 }
 0x149   : > { %v580_v59 = vmax.f32 %v547_v58, 0.0 }
 0x14b   : > { %646 = vmatmul.f32.gmra.mxu2 %v580_v59 }
 0x14e   : > { %v549_v60 = vpop.f32.mrf.mxu1 }
 0x14f   : > { %v550_v61 = vadd.f32 %v1168_v36, %v549_v60 }
 0x151   : > { %v581_v62 = vmax.f32 %v550_v61, 0.0 }
 0x153   : > { %649 = vmatmul.f32.gmra.mxu2 %v581_v62 }
 0x156   : > { %v552_v63 = vpop.f32.mrf.mxu1 }
 0x157   : > { %v553_v0 = vadd.f32 %v1168_v36, %v552_v63 }
 0x159   : > { %v582_v1 = vmax.f32 %v553_v0, 0.0 }
 0x15b   : > { %652 = vmatmul.f32.gmra.mxu2 %v582_v1 }
 0x15e   : > { %v555_v4 = vpop.f32.mrf.mxu1 }
 0x15f   : > { %v556_v5 = vadd.f32 %v1168_v36, %v555_v4 }
 0x161   : > { %v583_v7 = vmax.f32 %v556_v5, 0.0 }
 0x163   : > { %655 = vmatmul.f32.gmra.mxu2 %v583_v7 }
 0x166   : > { %v558_v11 = vpop.f32.mrf.mxu1 }
 0x167   : > { %v559_v12 = vadd.f32 %v1168_v36, %v558_v11 }
 0x169   : > { %v584_v14 = vmax.f32 %v559_v12, 0.0 }
 0x16b   : > { %658 = vmatmul.f32.gmra.mxu2 %v584_v14 }
 0x16e   : > { %v561_v19 = vpop.f32.mrf.mxu1 }
 0x16f   : > { %v562_v20 = vadd.f32 %v1168_v36, %v561_v19 }
 0x171   : > { %v585_v22 = vmax.f32 %v562_v20, 0.0 }
 0x173   : > { %661 = vmatmul.f32.gmra.mxu2 %v585_v22 }
 0x176   : > { %v564_v25 = vpop.f32.mrf.mxu1 }
 0x177   : > { %v565_v26 = vadd.f32 %v1168_v36, %v564_v25 }
 0x179   : > { %v586_v28 = vmax.f32 %v565_v26, 0.0 }
 0x17b   : > { %664 = vmatmul.f32.gmra.mxu2 %v586_v28 }
 0x17e   : > { %v567_v30 = vpop.f32.mrf.mxu1 }
 0x17f   : > { %v568_v31 = vadd.f32 %v1168_v36, %v567_v30 }
 0x181   : > { %v587_v32 = vmax.f32 %v568_v31, 0.0 }
 0x183   : > { %667 = vmatmul.f32.gmra.mxu2 %v587_v32 }
 0x186   : > { %v570_v33 = vpop.f32.mrf.mxu1 }
 0x187   : > { %v571_v35 = vadd.f32 %v1168_v36, %v570_v33 }
 0x189   : > { %v588_v37 = vmax.f32 %v571_v35, 0.0 }
 0x18b   : > { %670 = vmatmul.f32.gmra.mxu2 %v588_v37 }
 0x196   : > { %v626_v39 = vpop.f32.mrf.mxu2 }
 0x197   : > { %v627_v40 = vadd.f32 %v900_v38, %v626_v39 }
 0x199   : > { %v674_v41 = vmax.f32 %v627_v40, 0.0 }
 0x19b   : > { %726 = vmatmul.f32.vlgmr.msra.gmra.mxu3 %v674_v41 }
 0x19e   : > { %v629_v42 = vpop.f32.mrf.mxu2 }
 0x19f   : > { %v630_v43 = vadd.f32 %v900_v38, %v629_v42 }
 0x1a1   : > { %v675_v34 = vmax.f32 %v630_v43, 0.0 }
 0x1a3   : > { %729 = vmatmul.f32.gmra.mxu3 %v675_v34 }
 0x1a6   : > { %v632_v44 = vpop.f32.mrf.mxu2 }
 0x1a7   : > { %v633_v45 = vadd.f32 %v900_v38, %v632_v44 }
 0x1a9   : > { %v676_v46 = vmax.f32 %v633_v45, 0.0 }
 0x1ab   : > { %732 = vmatmul.f32.gmra.mxu3 %v676_v46 }
 0x1ae   : > { %v635_v47 = vpop.f32.mrf.mxu2 }
 0x1af   : > { %v636_v36 = vadd.f32 %v900_v38, %v635_v47 }
 0x1b1   : > { %v677_v48 = vmax.f32 %v636_v36, 0.0 }
 0x1b3   : > { %735 = vmatmul.f32.gmra.mxu3 %v677_v48 }
 0x1b6   : > { %v638_v49 = vpop.f32.mrf.mxu2 }
 0x1b7   : > { %v639_v50 = vadd.f32 %v900_v38, %v638_v49 }
 0x1b9   : > { %v678_v51 = vmax.f32 %v639_v50, 0.0 }
 0x1bb   : > { %738 = vmatmul.f32.gmra.mxu3 %v678_v51 }
 0x1be   : > { %v641_v52 = vpop.f32.mrf.mxu2 }
 0x1bf   : > { %v642_v53 = vadd.f32 %v900_v38, %v641_v52 }
 0x1c1   : > { %v679_v54 = vmax.f32 %v642_v53, 0.0 }
 0x1c3   : > { %741 = vmatmul.f32.gmra.mxu3 %v679_v54 }
 0x1c6   : > { %v644_v55 = vpop.f32.mrf.mxu2 }
 0x1c7   : > { %v645_v56 = vadd.f32 %v900_v38, %v644_v55 }
 0x1c9   : > { %v680_v57 = vmax.f32 %v645_v56, 0.0 }
 0x1cb   : > { %744 = vmatmul.f32.gmra.mxu3 %v680_v57 }
 0x1ce   : > { %v647_v58 = vpop.f32.mrf.mxu2 }
 0x1cf   : > { %v648_v59 = vadd.f32 %v900_v38, %v647_v58 }
 0x1d1   : > { %v681_v60 = vmax.f32 %v648_v59, 0.0 }
 0x1d3   : > { %747 = vmatmul.f32.gmra.mxu3 %v681_v60 }
 0x1d6   : > { %v650_v61 = vpop.f32.mrf.mxu2 }
 0x1d7   : > { %v651_v62 = vadd.f32 %v900_v38, %v650_v61 }
 0x1d9   : > { %v682_v63 = vmax.f32 %v651_v62, 0.0 }
 0x1db   : > { %750 = vmatmul.f32.gmra.mxu3 %v682_v63 }
 0x1de   : > { %v653_v0 = vpop.f32.mrf.mxu2 }
 0x1df   : > { %v654_v1 = vadd.f32 %v900_v38, %v653_v0 }
 0x1e1   : > { %v683_v2 = vmax.f32 %v654_v1, 0.0 }
 0x1e3   : > { %753 = vmatmul.f32.gmra.mxu3 %v683_v2 }
 0x1e6   : > { %v656_v3 = vpop.f32.mrf.mxu2 }
 0x1e7   : > { %v657_v4 = vadd.f32 %v900_v38, %v656_v3 }
 0x1e9   : > { %v684_v5 = vmax.f32 %v657_v4, 0.0 }
 0x1eb   : > { %756 = vmatmul.f32.gmra.mxu3 %v684_v5 }
 0x1ee   : > { %v659_v6 = vpop.f32.mrf.mxu2 }
 0x1ef   : > { %v660_v7 = vadd.f32 %v900_v38, %v659_v6 }
 0x1f1   : > { %v685_v8 = vmax.f32 %v660_v7, 0.0 }
 0x1f3   : > { %759 = vmatmul.f32.gmra.mxu3 %v685_v8 }
 0x1f6   : > { %v662_v9 = vpop.f32.mrf.mxu2 }
 0x1f7   : > { %v663_v10 = vadd.f32 %v900_v38, %v662_v9 }
 0x1f9   : > { %v686_v11 = vmax.f32 %v663_v10, 0.0 }
 0x1fb   : > { %762 = vmatmul.f32.gmra.mxu3 %v686_v11 }
 0x1fe   : > { %v665_v12 = vpop.f32.mrf.mxu2 }
 0x1ff   : > { %v666_v13 = vadd.f32 %v900_v38, %v665_v12 }
 0x201   : > { %v687_v14 = vmax.f32 %v666_v13, 0.0 }
 0x203   : > { %765 = vmatmul.f32.gmra.mxu3 %v687_v14 }
 0x206   : > { %v668_v15 = vpop.f32.mrf.mxu2 }
 0x207   : > { %v669_v16 = vadd.f32 %v900_v38, %v668_v15 }
 0x209   : > { %v688_v17 = vmax.f32 %v669_v16, 0.0 }
 0x20b   : > { %768 = vmatmul.f32.gmra.mxu3 %v688_v17 }
 0x20e   : > { %v671_v18 = vpop.f32.mrf.mxu2 }
 0x20f   : > { %v672_v19 = vadd.f32 %v900_v38, %v671_v18 }
 0x211   : > { %v689_v20 = vmax.f32 %v672_v19, 0.0 }
 0x213   : > { %771 = vmatmul.f32.gmra.mxu3 %v689_v20 }
 0x21e   : > { %v727_v22 = vpop.f32.mrf.mxu3 }
 0x21f   : > { %v728_v23 = vadd.f32 %v1240_v21, %v727_v22 }
 0x221   : > { %902 = vtanh.f32 %v728_v23 }
 0x226   : > { %v730_v24 = vpop.f32.mrf.mxu3 }
 0x227   : > { %v903_v25 = vpop.eup %902  ;;  %v731_v26 = vadd.f32 %v1240_v21, %v730_v24 }
 0x228   : > { %791 = vst [vmem:[%s1248_s19] sm:$0xff] %v903_v25 }
 0x229   : > { %904 = vtanh.f32 %v731_v26 }
 0x22e   : > { %v733_v27 = vpop.f32.mrf.mxu3 }
 0x22f   : > { %v905_v28 = vpop.eup %904  ;;  %v734_v29 = vadd.f32 %v1240_v21, %v733_v27 }
 0x230   : > { %792 = vst [vmem:[%s1248_s19 + $0x8] sm:$0xff] %v905_v28 }
 0x231   : > { %906 = vtanh.f32 %v734_v29 }
 0x236   : > { %v736_v30 = vpop.f32.mrf.mxu3 }
 0x237   : > { %v907_v31 = vpop.eup %906  ;;  %v737_v32 = vadd.f32 %v1240_v21, %v736_v30 }
 0x238   : > { %793 = vst [vmem:[%s1248_s19 + $0x10] sm:$0xff] %v907_v31 }
 0x239   : > { %908 = vtanh.f32 %v737_v32 }
 0x23e   : > { %v739_v33 = vpop.f32.mrf.mxu3 }
 0x23f   : > { %v909_v35 = vpop.eup %908  ;;  %v740_v37 = vadd.f32 %v1240_v21, %v739_v33 }
 0x240   : > { %794 = vst [vmem:[%s1248_s19 + $0x18] sm:$0xff] %v909_v35 }
 0x241   : > { %910 = vtanh.f32 %v740_v37 }
 0x246   : > { %v742_v38 = vpop.f32.mrf.mxu3 }
 0x247   : > { %v911_v39 = vpop.eup %910  ;;  %v743_v40 = vadd.f32 %v1240_v21, %v742_v38 }
 0x248   : > { %795 = vst [vmem:[%s1248_s19 + $0x20] sm:$0xff] %v911_v39 }
 0x249   : > { %912 = vtanh.f32 %v743_v40 }
 0x24e   : > { %v745_v41 = vpop.f32.mrf.mxu3 }
 0x24f   : > { %v913_v42 = vpop.eup %912  ;;  %v746_v43 = vadd.f32 %v1240_v21, %v745_v41 }
 0x250   : > { %796 = vst [vmem:[%s1248_s19 + $0x28] sm:$0xff] %v913_v42 }
 0x251   : > { %914 = vtanh.f32 %v746_v43 }
 0x256   : > { %v748_v34 = vpop.f32.mrf.mxu3 }
 0x257   : > { %v915_v44 = vpop.eup %914  ;;  %v749_v45 = vadd.f32 %v1240_v21, %v748_v34 }
 0x258   : > { %797 = vst [vmem:[%s1248_s19 + $0x30] sm:$0xff] %v915_v44 }
 0x259   : > { %916 = vtanh.f32 %v749_v45 }
 0x25e   : > { %v751_v46 = vpop.f32.mrf.mxu3 }
 0x25f   : > { %v917_v47 = vpop.eup %916  ;;  %v752_v36 = vadd.f32 %v1240_v21, %v751_v46 }
 0x260   : > { %798 = vst [vmem:[%s1248_s19 + $0x38] sm:$0xff] %v917_v47 }
 0x261   : > { %918 = vtanh.f32 %v752_v36 }
 0x266   : > { %v754_v48 = vpop.f32.mrf.mxu3 }
 0x267   : > { %v919_v49 = vpop.eup %918  ;;  %v755_v50 = vadd.f32 %v1240_v21, %v754_v48 }
 0x268   : > { %799 = vst [vmem:[%s1248_s19 + $0x40] sm:$0xff] %v919_v49 }
 0x269   : > { %920 = vtanh.f32 %v755_v50 }
 0x26e   : > { %v757_v51 = vpop.f32.mrf.mxu3 }
 0x26f   : > { %v921_v52 = vpop.eup %920  ;;  %v758_v53 = vadd.f32 %v1240_v21, %v757_v51 }
 0x270   : > { %800 = vst [vmem:[%s1248_s19 + $0x48] sm:$0xff] %v921_v52 }
 0x271   : > { %922 = vtanh.f32 %v758_v53 }
 0x276   : > { %v760_v54 = vpop.f32.mrf.mxu3 }
 0x277   : > { %v923_v55 = vpop.eup %922  ;;  %v761_v56 = vadd.f32 %v1240_v21, %v760_v54 }
 0x278   : > { %801 = vst [vmem:[%s1248_s19 + $0x50] sm:$0xff] %v923_v55 }
 0x279   : > { %924 = vtanh.f32 %v761_v56 }
 0x27e   : > { %v763_v57 = vpop.f32.mrf.mxu3 }
 0x27f   : > { %v925_v58 = vpop.eup %924  ;;  %v764_v59 = vadd.f32 %v1240_v21, %v763_v57 }
 0x280   : > { %802 = vst [vmem:[%s1248_s19 + $0x58] sm:$0xff] %v925_v58 }
 0x281   : > { %926 = vtanh.f32 %v764_v59 }
 0x286   : > { %v766_v60 = vpop.f32.mrf.mxu3 }
 0x287   : > { %v927_v61 = vpop.eup %926  ;;  %v767_v62 = vadd.f32 %v1240_v21, %v766_v60 }
 0x288   : > { %803 = vst [vmem:[%s1248_s19 + $0x60] sm:$0xff] %v927_v61 }
 0x289   : > { %928 = vtanh.f32 %v767_v62 }
 0x28e   : > { %v769_v63 = vpop.f32.mrf.mxu3 }
 0x28f   : > { %v929_v0 = vpop.eup %928  ;;  %v770_v1 = vadd.f32 %v1240_v21, %v769_v63 }
 0x290   : > { %804 = vst [vmem:[%s1248_s19 + $0x68] sm:$0xff] %v929_v0 }
 0x291   : > { %930 = vtanh.f32 %v770_v1 }
 0x296   : > { %v772_v2 = vpop.f32.mrf.mxu3 }
 0x297   : > { %v931_v3 = vpop.eup %930  ;;  %v773_v4 = vadd.f32 %v1240_v21, %v772_v2 }
 0x298   : > { %805 = vst [vmem:[%s1248_s19 + $0x70] sm:$0xff] %v931_v3 }
 0x299   : > { %932 = vtanh.f32 %v773_v4 }
 0x29f   : > { %v933_v5 = vpop.eup %932 }
 0x2a0   : > { %806 = vst [vmem:[%s1248_s19 + $0x78] sm:$0xff] %v933_v5 }
 0x2a1 PF: > { %s19_s30 = sadd.s32 1, %s940_s30  }
 0x2a2   : > { %p16_p4 = scmp.ge.s32.totalorder %s19_s30, 4  }
 0x2a4   :  { %18 = sbr.rel (!%p16_p4) target bundleno = 1 (0x1), region = 86 }

</bundles_post_ra>
